<compile_context>
chip_gen: v6e
topology: v6e:2x2x1
jax: 0.10.0
libtpu: 0.0.40
codegen_flags: <defaults>
</compile_context>

<pallas_src>
import jax
import jax.numpy as jnp
from jax import lax
from jax.experimental import pallas as pl
from jax.experimental.pallas import tpu as pltpu


def up_conv_forward(x, params):
    """x: [N, C_in, H, W] (NCHW) -> [N, C_out, 2H, 2W] (NCHW)."""
    w, b, gamma, beta, run_mean, run_var, eps = (
        params["w"], params["b"], params["gamma"], params["beta"],
        params["running_mean"], params["running_var"], params["eps"],
    )
    N, C_in, H, W = x.shape
    C_out = w.shape[0]

    WP = W + 2              # padded row stride of the flattened spatial axis
    MV = H * WP             # flat base positions per image (incl. 2 junk cols / row)
    LP = (H + 3) * WP       # flat padded length (keeps every shifted read in-bounds)

    # ---------------- XLA-side prep (all at 1x original-resolution cost) ----------------
    # Pad 1 top / 2 bottom rows, 1 left / 1 right cols; flatten spatial (free reshape).
    xp = jnp.pad(x, ((0, 0), (0, 0), (1, 2), (1, 1)))            # [N, C_in, H+3, W+2]
    xf = xp.reshape(N, C_in, LP).astype(jnp.bfloat16)

    # Fold Upsample(2x, nearest) into the conv weights: 4 phases x 4 taps.
    # RF[parity, tap, k]: which 3x3 rows/cols collapse onto which of the 2 taps.
    RF = jnp.array([[[1., 0., 0.], [0., 1., 1.]],
                    [[1., 1., 0.], [0., 0., 1.]]], jnp.float32)
    wf = jnp.einsum('iak,jbl,ockl->ijaboc', RF, RF, w.astype(jnp.float32))
    # Scatter the 4 taps of each phase into one [4*C_out, 9*C_in] LHS whose column
    # blocks follow the 9 shifted slabs (dr, dc) in row-major order.
    w_big = jnp.zeros((4, C_out, 3, 3, C_in), jnp.float32)
    for pi in range(2):
        for pj in range(2):
            for a in range(2):
                for bb in range(2):
                    w_big = w_big.at[2 * pi + pj, :, pi + a, pj + bb, :].set(
                        wf[pi, pj, a, bb])
    w_big = w_big.reshape(4 * C_out, 9 * C_in).astype(jnp.bfloat16)

    # Fold conv bias + BatchNorm (eval mode) into per-channel scale/shift,
    # replicated phase-major to match the fused [4*C_out, MV] accumulator rows.
    inv_std = 1.0 / jnp.sqrt(run_var + eps)
    scale = (gamma * inv_std).astype(jnp.float32)
    shift = ((b - run_mean) * gamma * inv_std + beta).astype(jnp.float32)
    sc_big = jnp.tile(scale.reshape(1, C_out), (4, 1)).reshape(4 * C_out, 1)
    sh_big = jnp.tile(shift.reshape(1, C_out), (4, 1)).reshape(4 * C_out, 1)

    # ------------------------ grid-step batching heuristic ------------------------
    per_img_bytes = C_in * LP * 2 + 4 * C_out * MV * 2
    Nb = max(1, min(N, (512 * 1024) // max(per_img_bytes, 1)))
    if Nb >= N and N >= 2:
        Nb = N // 2                       # keep >= 2 grid steps for v7x's 2 TCs
    while N % Nb:                         # make Nb a divisor of N
        Nb -= 1

    # ----------------------------------- kernel -----------------------------------
    def kernel(xf_ref, w_ref, sc_ref, sh_ref, o_ref):
        # xf_ref: (Nb, C_in, LP) bf16       w_ref: (4*C_out, 9*C_in) bf16
        # sc/sh : (4*C_out, 1)  f32         o_ref: (Nb, 4*C_out, MV) bf16
        wmat = w_ref[...]
        sc = sc_ref[...]
        sh = sh_ref[...]
        for n in range(Nb):               # static, small
            # 9 distinct statically shifted slabs (lane-contiguous views), read once.
            slabs = [xf_ref[n, :, dr * WP + dc: dr * WP + dc + MV]
                     for dr in range(3) for dc in range(3)]
            rhs = jnp.concatenate(slabs, axis=0)                  # (9*C_in, MV) bf16
            acc = jnp.dot(wmat, rhs,
                          preferred_element_type=jnp.float32)     # (4*C_out, MV) f32
            y = jnp.maximum(acc * sc + sh, 0.0)                   # bias+BN+ReLU in f32
            o_ref[n] = y.astype(o_ref.dtype)

    flops = 2 * N * (4 * C_out) * (9 * C_in) * MV
    bytes_accessed = (xf.size * 2 + w_big.size * 2
                      + (sc_big.size + sh_big.size) * 4
                      + N * 4 * C_out * MV * 2)

    in_block_b = Nb * C_in * LP * 2
    out_block_b = Nb * 4 * C_out * MV * 2
    const_b = w_big.size * 2 + (sc_big.size + sh_big.size) * 4
    working = 2 * (in_block_b + out_block_b) + 2 * const_b        # double-buffered
    vmem_limit = int(min(64 * 1024 * 1024,
                         max(4 * working + 2 * 1024 * 1024, 16 * 1024 * 1024)))

    out_k = pl.pallas_call(
        kernel,
        out_shape=jax.ShapeDtypeStruct((N, 4 * C_out, MV), jnp.bfloat16),
        grid=(N // Nb,),
        in_specs=[
            pl.BlockSpec((Nb, C_in, LP), lambda n: (n, 0, 0)),
            pl.BlockSpec((4 * C_out, 9 * C_in), lambda n: (0, 0)),
            pl.BlockSpec((4 * C_out, 1), lambda n: (0, 0)),
            pl.BlockSpec((4 * C_out, 1), lambda n: (0, 0)),
        ],
        out_specs=pl.BlockSpec((Nb, 4 * C_out, MV), lambda n: (n, 0, 0)),
        compiler_params=pltpu.CompilerParams(
            dimension_semantics=("parallel",),
            vmem_limit_bytes=vmem_limit),
        cost_estimate=pl.CostEstimate(flops=flops, transcendentals=0,
                                      bytes_accessed=bytes_accessed),
    )(xf, w_big, sc_big, sh_big)

    # -------- epilogue (bf16): drop junk columns, interleave phases -> NCHW --------
    # out_k[n, (2*pi+pj)*C_out + o, p*WP + q]  ->  out[n, o, 2p+pi, 2q+pj]
    out6 = out_k.reshape(N, 2, 2, C_out, H, WP)[:, :, :, :, :, :W]
    out = out6.transpose(0, 3, 4, 1, 5, 2).reshape(N, C_out, 2 * H, 2 * W)
    return out.astype(x.dtype)


def _reference_forward(x, params):
    """Pure-JAX reference (lax conv) for correctness check."""
    w, b, gamma, beta, run_mean, run_var, eps = (
        params["w"], params["b"], params["gamma"], params["beta"],
        params["running_mean"], params["running_var"], params["eps"],
    )
    x_up = jnp.repeat(jnp.repeat(x, 2, axis=2), 2, axis=3)
    y = lax.conv_general_dilated(
        x_up.astype(jnp.float32), w.astype(jnp.float32),
        window_strides=(1, 1), padding=((1, 1), (1, 1)),
        dimension_numbers=("NCHW", "OIHW", "NCHW"))
    y = y + b.reshape(1, -1, 1, 1)
    y = (y - run_mean.reshape(1, -1, 1, 1)) / jnp.sqrt(run_var.reshape(1, -1, 1, 1) + eps)
    y = y * gamma.reshape(1, -1, 1, 1) + beta.reshape(1, -1, 1, 1)
    return jnp.maximum(y, 0.0)


def init_params(key, ch_in, ch_out):
    k_w, k_b, k_g, k_bt, k_m, k_v = jax.random.split(key, 6)
    fan_in = ch_in * 9
    bound = 1.0 / jnp.sqrt(fan_in)
    return {
        "w": jax.random.uniform(k_w, (ch_out, ch_in, 3, 3), jnp.float32, -bound, bound),
        "b": jax.random.uniform(k_b, (ch_out,), jnp.float32, -bound, bound),
        "gamma": jax.random.uniform(k_g, (ch_out,), jnp.float32, 0.5, 1.5),
        "beta": 0.1 * jax.random.normal(k_bt, (ch_out,), jnp.float32),
        "running_mean": 0.1 * jax.random.normal(k_m, (ch_out,), jnp.float32),
        "running_var": jax.random.uniform(k_v, (ch_out,), jnp.float32, 0.5, 1.5),
        "eps": 1e-5,
    }


if __name__ == "__main__":
    key = jax.random.PRNGKey(0)
    k_x, k_p = jax.random.split(key)

    N, C_in, C_out, H, W = 2, 4, 8, 16, 16
    x = jax.random.normal(k_x, (N, C_in, H, W), jnp.float32)
    params = init_params(k_p, C_in, C_out)

    fwd = jax.jit(up_conv_forward)
    out = jax.block_until_ready(fwd(x, params))
    assert out.shape == (N, C_out, 2 * H, 2 * W), out.shape

    ref = jax.block_until_ready(_reference_forward(x, params))
    # bf16 operands + bf16 kernel output (f32 MXU accumulation) -> loose tolerance.
    max_err = float(jnp.max(jnp.abs(out - ref)))
    assert max_err < 6e-2, max_err

    print("KERNEL_OK")
</pallas_src>

<mosaic_0001>
module attributes {stable_mosaic.version = 11 : i64} {
  func.func @kernel(%arg0: i32, %arg1: memref<1x4x342xbf16, #tpu.memory_space<vmem>>, %arg2: memref<32x36xbf16, #tpu.memory_space<vmem>>, %arg3: memref<32x1xf32, #tpu.memory_space<vmem>>, %arg4: memref<32x1xf32, #tpu.memory_space<vmem>>, %arg5: memref<1x32x288xbf16, #tpu.memory_space<vmem>>) attributes {dimension_semantics = [#tpu.dimension_semantics<parallel>], iteration_bounds = array<i64: 2>, scalar_prefetch = 0 : i64, scratch_operands = 0 : i64, tpu.core_type = #tpu.core_type<tc>, window_params = [{transform_indices = @transform_0, window_bounds = array<i64: 1, 4, 342>}, {pipeline_mode = #tpu.pipeline_mode<synchronous>, transform_indices = @transform_1, window_bounds = array<i64: 32, 36>}, {pipeline_mode = #tpu.pipeline_mode<synchronous>, transform_indices = @transform_2, window_bounds = array<i64: 32, 1>}, {pipeline_mode = #tpu.pipeline_mode<synchronous>, transform_indices = @transform_3, window_bounds = array<i64: 32, 1>}, {transform_indices = @transform_4, window_bounds = array<i64: 1, 32, 288>}]} {
    %c0 = arith.constant 0 : index
    %c0_0 = arith.constant 0 : index
    %0 = vector.load %arg2[%c0, %c0_0] : memref<32x36xbf16, #tpu.memory_space<vmem>>, vector<32x36xbf16>
    %c0_1 = arith.constant 0 : index
    %c0_2 = arith.constant 0 : index
    %1 = vector.load %arg3[%c0_1, %c0_2] : memref<32x1xf32, #tpu.memory_space<vmem>>, vector<32x1xf32>
    %c0_3 = arith.constant 0 : index
    %c0_4 = arith.constant 0 : index
    %2 = vector.load %arg4[%c0_3, %c0_4] : memref<32x1xf32, #tpu.memory_space<vmem>>, vector<32x1xf32>
    %c0_5 = arith.constant 0 : index
    %c0_6 = arith.constant 0 : index
    %c0_7 = arith.constant 0 : index
    %3 = vector.load %arg1[%c0_5, %c0_6, %c0_7] : memref<1x4x342xbf16, #tpu.memory_space<vmem>>, vector<1x4x288xbf16>
    %4 = vector.shape_cast %3 : vector<1x4x288xbf16> to vector<4x288xbf16>
    %c0_8 = arith.constant 0 : index
    %c0_9 = arith.constant 0 : index
    %c1 = arith.constant 1 : index
    %5 = vector.load %arg1[%c0_8, %c0_9, %c1] : memref<1x4x342xbf16, #tpu.memory_space<vmem>>, vector<1x4x288xbf16>
    %6 = vector.shape_cast %5 : vector<1x4x288xbf16> to vector<4x288xbf16>
    %c0_10 = arith.constant 0 : index
    %c0_11 = arith.constant 0 : index
    %c2 = arith.constant 2 : index
    %7 = vector.load %arg1[%c0_10, %c0_11, %c2] : memref<1x4x342xbf16, #tpu.memory_space<vmem>>, vector<1x4x288xbf16>
    %8 = vector.shape_cast %7 : vector<1x4x288xbf16> to vector<4x288xbf16>
    %c0_12 = arith.constant 0 : index
    %c0_13 = arith.constant 0 : index
    %c18 = arith.constant 18 : index
    %9 = vector.load %arg1[%c0_12, %c0_13, %c18] : memref<1x4x342xbf16, #tpu.memory_space<vmem>>, vector<1x4x288xbf16>
    %10 = vector.shape_cast %9 : vector<1x4x288xbf16> to vector<4x288xbf16>
    %c0_14 = arith.constant 0 : index
    %c0_15 = arith.constant 0 : index
    %c19 = arith.constant 19 : index
    %11 = vector.load %arg1[%c0_14, %c0_15, %c19] : memref<1x4x342xbf16, #tpu.memory_space<vmem>>, vector<1x4x288xbf16>
    %12 = vector.shape_cast %11 : vector<1x4x288xbf16> to vector<4x288xbf16>
    %c0_16 = arith.constant 0 : index
    %c0_17 = arith.constant 0 : index
    %c20 = arith.constant 20 : index
    %13 = vector.load %arg1[%c0_16, %c0_17, %c20] : memref<1x4x342xbf16, #tpu.memory_space<vmem>>, vector<1x4x288xbf16>
    %14 = vector.shape_cast %13 : vector<1x4x288xbf16> to vector<4x288xbf16>
    %c0_18 = arith.constant 0 : index
    %c0_19 = arith.constant 0 : index
    %c36 = arith.constant 36 : index
    %15 = vector.load %arg1[%c0_18, %c0_19, %c36] : memref<1x4x342xbf16, #tpu.memory_space<vmem>>, vector<1x4x288xbf16>
    %16 = vector.shape_cast %15 : vector<1x4x288xbf16> to vector<4x288xbf16>
    %c0_20 = arith.constant 0 : index
    %c0_21 = arith.constant 0 : index
    %c37 = arith.constant 37 : index
    %17 = vector.load %arg1[%c0_20, %c0_21, %c37] : memref<1x4x342xbf16, #tpu.memory_space<vmem>>, vector<1x4x288xbf16>
    %18 = vector.shape_cast %17 : vector<1x4x288xbf16> to vector<4x288xbf16>
    %c0_22 = arith.constant 0 : index
    %c0_23 = arith.constant 0 : index
    %c38 = arith.constant 38 : index
    %19 = vector.load %arg1[%c0_22, %c0_23, %c38] : memref<1x4x342xbf16, #tpu.memory_space<vmem>>, vector<1x4x288xbf16>
    %20 = vector.shape_cast %19 : vector<1x4x288xbf16> to vector<4x288xbf16>
    %21 = tpu.concatenate %4, %6, %8, %10, %12, %14, %16, %18, %20 in 0 : vector<4x288xbf16>, vector<4x288xbf16>, vector<4x288xbf16>, vector<4x288xbf16>, vector<4x288xbf16>, vector<4x288xbf16>, vector<4x288xbf16>, vector<4x288xbf16>, vector<4x288xbf16> -> vector<36x288xbf16>
    %cst = arith.constant dense<0.000000e+00> : vector<32x288xf32>
    %22 = tpu.matmul %0, %21, %cst {dimension_numbers = #tpu.dot_dimension_numbers<[1], [0], [0], [1], [0, 0, 1, 1], [], []>} : vector<32x36xbf16>, vector<36x288xbf16>, vector<32x288xf32> -> vector<32x288xf32>
    %23 = vector.broadcast %1 : vector<32x1xf32> to vector<32x288xf32>
    %24 = arith.mulf %22, %23 : vector<32x288xf32>
    %25 = vector.broadcast %2 : vector<32x1xf32> to vector<32x288xf32>
    %26 = arith.addf %24, %25 : vector<32x288xf32>
    %cst_24 = arith.constant 0.000000e+00 : f32
    %27 = vector.broadcast %cst_24 : f32 to vector<32x288xf32>
    %28 = arith.maximumf %26, %27 : vector<32x288xf32>
    %29 = arith.truncf %28 : vector<32x288xf32> to vector<32x288xbf16>
    %c0_25 = arith.constant 0 : index
    %c0_26 = arith.constant 0 : index
    %c0_27 = arith.constant 0 : index
    %30 = vector.load %arg5[%c0_25, %c0_26, %c0_27] : memref<1x32x288xbf16, #tpu.memory_space<vmem>>, vector<1x32x288xbf16>
    %31 = vector.shape_cast %30 : vector<1x32x288xbf16> to vector<32x288xbf16>
    %32 = vector.shape_cast %29 : vector<32x288xbf16> to vector<1x32x288xbf16>
    tpu.vector_store %arg5[%c0_25, %c0_26, %c0_27], %32 {strides = array<i32>} : memref<1x32x288xbf16, #tpu.memory_space<vmem>>, vector<1x32x288xbf16>,
    return
  }
  func.func @transform_0(%arg0: i32) -> (i32, i32, i32) {
    %c0_i32 = arith.constant 0 : i32
    %c0_i32_0 = arith.constant 0 : i32
    %c0_i32_1 = arith.constant 0 : i32
    return %arg0, %c0_i32, %c0_i32_0 : i32, i32, i32
  }
  func.func @transform_1(%arg0: i32) -> (i32, i32) {
    %c0_i32 = arith.constant 0 : i32
    %c0_i32_0 = arith.constant 0 : i32
    %c0_i32_1 = arith.constant 0 : i32
    return %c0_i32, %c0_i32_0 : i32, i32
  }
  func.func @transform_2(%arg0: i32) -> (i32, i32) {
    %c0_i32 = arith.constant 0 : i32
    %c0_i32_0 = arith.constant 0 : i32
    %c0_i32_1 = arith.constant 0 : i32
    return %c0_i32, %c0_i32_0 : i32, i32
  }
  func.func @transform_3(%arg0: i32) -> (i32, i32) {
    %c0_i32 = arith.constant 0 : i32
    %c0_i32_0 = arith.constant 0 : i32
    %c0_i32_1 = arith.constant 0 : i32
    return %c0_i32, %c0_i32_0 : i32, i32
  }
  func.func @transform_4(%arg0: i32) -> (i32, i32, i32) {
    %c0_i32 = arith.constant 0 : i32
    %c0_i32_0 = arith.constant 0 : i32
    %c0_i32_1 = arith.constant 0 : i32
    return %arg0, %c0_i32, %c0_i32_0 : i32, i32, i32
  }
}

</mosaic_0001>

<bundles_post_ra>
// kernel: tile.14
= control target key start
LH: loop header
LB: loop body
LE: loop exit
PB: predicated region body
PF: predicated region fallthrough
CT: control target
= control target key end

     0   :  { %s22_s0 = inlined_call_operand.vmem [shape: f32[8], index: 0, kind: input, shape index: {}]   ;;  %s23_s1 = inlined_call_operand.vmem [shape: f32[4,1,1,8], index: 1, kind: output, shape index: {}]  }
   0x1   :  { %v4_v0 = vld [vmem:[%s22_s0] ss:$0 sm:$0xff] }
   0x2   :  { %5 = vst [vmem:[%s23_s1] sm:$0xf] %v4_v0 }

// kernel: tile.0
= control target key start
LH: loop header
LB: loop body
LE: loop exit
PB: predicated region body
PF: predicated region fallthrough
CT: control target
= control target key end

     0   :  { %s67_s8 = smov 125   ;;  %vm8_vm0 = vcmask 7168   ;;  %s68_s11 = smov 126   ;;  %s118_s0 = inlined_call_operand.vmem [shape: f32[4,1,1,8], index: 0, kind: input, shape index: {}]   ;;  %s119_s1 = inlined_call_operand.vmem [shape: f32[32,1], index: 1, kind: output, shape index: {}]  }
   0x1   :  { %v5_v0 = vld [vmem:[%s118_s0] sm:$0xf]  ;;  %s66_s0 = smov 127   ;;  %s69_s12 = smov 124  }
   0x2   :  { %6 = vst [vmem:[#allocation0] sm:$0xf] %v5_v0  ;;  %s70_s13 = smov 123   ;;  %s71_s14 = smov 122  }
   0x3   :  { %s72_s15 = smov 121  }
   0x9   :  { %v10_v1 = vld [vmem:[#allocation0] sm:$0xf]  }
   0xa   :  { %v22_v2 = vld [vmem:[#allocation0] sm:$0xf]   ;;  %11 = vrot.lane.b32.xlu0 %v10_v1, %s66_s0 }
   0xb   :  { %23 = vrot.lane.b32.xlu1 %v22_v2, %s67_s8  ;;  %v16_v3 = vld [vmem:[#allocation0] sm:$0xf]  }
   0xc   :  { %v28_v4 = vld [vmem:[#allocation0] sm:$0xf]  }
   0xd   :  { %v7_v5 = vld [vmem:[#allocation0] sm:$0xf]  }
   0xe   :  { %9 = vst.msk [vmem:[%s119_s1] ss:$8 sm:$0xf] %vm8_vm0, %v7_v5   ;;  %17 = vrot.lane.b32.xlu0 %v16_v3, %s68_s11  ;;  %v34_v6 = vld [vmem:[#allocation0] sm:$0xf]  }
   0xf   :  { %29 = vrot.lane.b32.xlu1 %v28_v4, %s69_s12  ;;  %v40_v7 = vld [vmem:[#allocation0] sm:$0xf]  }
  0x10   :  { %v46_v8 = vld [vmem:[#allocation0] sm:$0xf]  }
  0x12   :  { %35 = vrot.lane.b32.xlu0 %v34_v6, %s70_s13 }
  0x13   :  { %41 = vrot.lane.b32.xlu1 %v40_v7, %s71_s14 }
  0x16   :  { %47 = vrot.lane.b32.xlu0 %v46_v8, %s72_s15 }
  0x7c   :  { %v12_v9 = vpop.permute.xlu0 %11  }
  0x7d   :  { %v24_v10 = vpop.permute.xlu1 %23   ;;  %52 = vst.msk [vmem:[%s119_s1 + $0x1] ss:$8 sm:$0xf] %vm8_vm0, %v12_v9  }
  0x7e   :  { %54 = vst.msk [vmem:[%s119_s1 + $0x3] ss:$8 sm:$0xf] %vm8_vm0, %v24_v10  }
  0x80   :  { %v18_v11 = vpop.permute.xlu0 %17  }
  0x81   :  { %v30_v12 = vpop.permute.xlu1 %29   ;;  %53 = vst.msk [vmem:[%s119_s1 + $0x2] ss:$8 sm:$0xf] %vm8_vm0, %v18_v11  }
  0x82   :  { %55 = vst.msk [vmem:[%s119_s1 + $0x4] ss:$8 sm:$0xf] %vm8_vm0, %v30_v12  }
  0x84   :  { %v36_v13 = vpop.permute.xlu0 %35  }
  0x85   :  { %v42_v14 = vpop.permute.xlu1 %41   ;;  %56 = vst.msk [vmem:[%s119_s1 + $0x5] ss:$8 sm:$0xf] %vm8_vm0, %v36_v13  }
  0x86   :  { %57 = vst.msk [vmem:[%s119_s1 + $0x6] ss:$8 sm:$0xf] %vm8_vm0, %v42_v14  }
  0x88   :  { %v48_v15 = vpop.permute.xlu0 %47  }
  0x89   :  { %58 = vst.msk [vmem:[%s119_s1 + $0x7] ss:$8 sm:$0xf] %vm8_vm0, %v48_v15  }

// kernel: up_conv_forward.1
= control target key start
LH: loop header
LB: loop body
LE: loop exit
PB: predicated region body
PF: predicated region fallthrough
CT: control target
= control target key end

     0   :  { %s789_s15 = smov 0   ;;  %s926_s0 = inlined_call_operand.vmem [shape: bf16[2,4,342], index: 0, kind: input, shape index: {}]   ;;  %s927_s1 = inlined_call_operand.vmem [shape: bf16[32,36], index: 1, kind: input, shape index: {}]   ;;  %s928_s2 = inlined_call_operand.vmem [shape: f32[32,1], index: 2, kind: input, shape index: {}]   ;;  %s929_s3 = inlined_call_operand.vmem [shape: f32[32,1], index: 3, kind: input, shape index: {}]   ;;  %s930_s4 = inlined_call_operand.vmem [shape: bf16[2,32,288], index: 4, kind: output, shape index: {}]  }
   0x1 LB: > { %s672_s16 = sadd.s32 4294967295, %s752_s15   ;;  %p676_p0 = scmp.ge.s32.totalorder %s752_s15, 1  ;;  %s752_s15 = sphi %s789_s15, %s14_s15  }
   0x2   : > { %p162_p1 = scmp.lt.s32.totalorder %s752_s15, 3 }
   0x4   : > { %p163_p2 = pnand %p676_p0, %p162_p1 }
   0x5   : > { %p188_p3 = scmp.lt.s32.totalorder (!%p163_p2), %s672_s16, 1  ;;  %s755_s21 = smov (!%p163_p2), 109  }
   0x6   : > { %166 = sbr.rel (%p163_p2) target bundleno = 401 (0x191), region = 36  ;;  %s756_s22 = smov (!%p163_p2), 90  }
   0x7   : > { %s757_s23 = smov (!%p163_p2), 108   ;;  %s758_s24 = smov (!%p163_p2), 92  }
   0x8   : > { %s759_s25 = smov (!%p163_p2), 91   ;;  %s760_s26 = smov (!%p163_p2), 127  }
   0x9   : > { %s762_s29 = smov (!%p163_p2), 126   ;;  %s763_s30 = smov (!%p163_p2), 110  }
   0xb   : > { %v217_v0 = vlaneseq  ;;  %v754_v1 = vmov 1983009808   ;;  %s932_s16 = smov (!%p188_p3, %s672_s16), 1  ;;  %v827_v17 = vld [vmem:[%s927_s1] sm:$0xff]   ;;  %vm374_vm0 = vcmask 293888   ;;  %v761_v18 = vmov 0  }
   0xc   : > { %v215_v2 = vunpack.c.l.s4 %v754_v1  ;;  %s720_s17 = smul.u32 6, %s932_s16  ;;  %715 = vmatprep.mubr.msk.bf16.mxu1 %vm374_vm0, %v827_v17  ;;  %422 = vmatprep.mubr.bf16.mxu0 %v761_v18  ;;  %v204_v19 = vld [vmem:[%s928_s2 + $0x8] sm:$0xff]  ;;  %v203_v20 = vld [vmem:[%s928_s2] sm:$0xff]  ;;  %v205_v21 = vld [vmem:[%s928_s2 + $0x10] sm:$0xff]  ;;  %vm313_vm1 = vcmask 1041408   ;;  %vm310_vm2 = vcmask 736256  }
   0xd   : > { %v218_v3 = vshrl.u32 %v217_v0, 7  ;;  %741 = vset.pattern.permute.xlu1 %v761_v18  ;;  %740 = vset.pattern.permute.xlu0 %v761_v18  ;;  %v206_v22 = vld [vmem:[%s928_s2 + $0x18] sm:$0xff]  ;;  %v207_v23 = vld [vmem:[%s929_s3] sm:$0xff]  ;;  %v208_v24 = vld [vmem:[%s929_s3 + $0x8] sm:$0xff]  ;;  %vm283_vm3 = vcmask 883712   ;;  %vm292_vm4 = vcmask 752640  }
   0xe   : > { %v216_v4 = vunpack.c.0.s8 %v215_v2  ;;  %s192_s20 = scalar_lea.vmem %s926_s0, %s720_s17  ;;  %v209_v25 = vld [vmem:[%s929_s3 + $0x10] sm:$0xff]  ;;  %v210_v26 = vld [vmem:[%s929_s3 + $0x18] sm:$0xff]  ;;  %vm274_vm5 = vcmask 891904   ;;  %vm323_vm6 = vcmask 1043456   ;;  %vm301_vm7 = vcmask 744448  }
   0xf   : > { %v211_v6 = vld [vmem:[%s192_s20] sm:$0x3f]  ;;  %vm330_vm8 = vcmask 1045504   ;;  %vm244_vm9 = vcmask 1039360   ;;  %vm255_vm10 = vcmask 1031168   ;;  %vm265_vm11 = vcmask 900096  }
  0x10   : > { %v219_v5 = vsub.s32 %v216_v4, %v218_v3  ;;  %v213_v8 = vcombine.high %v211_v6, %v211_v6  ;;  %v229_v10 = vcombine.low %v211_v6, %v211_v6  ;;  %vm609_vm12 = vcmask 257024  }
  0x12   : > { %v803_v7 = vrot.slane %v211_v6, %v219_v5  ;;  %v807_v9 = vrot.slane %v213_v8, %v219_v5  ;;  %v236_v12 = vrot.slane %v229_v10, %v219_v5 }
  0x14   : > { %268 = vrot.lane.b32.xlu1 %v803_v7, %s755_s21  ;;  %304 = vrot.lane.b32.xlu0 %v803_v7, %s756_s22  ;;  %v813_v11 = vcombine.high %v803_v7, %v803_v7  ;;  %v237_v13 = vcombine.high %v236_v12, %v236_v12  ;;  %v247_v14 = vcombine.low %v803_v7, %v803_v7 }
  0x15   : > { %v248_v15 = vcombine.low %v807_v9, %v807_v9  ;;  %v258_v16 = vcombine.low %v236_v12, %v236_v12 }
  0x18   : > { %281 = vrot.lane.b32.xlu0 %v803_v7, %s757_s23  ;;  %308 = vrot.lane.b32.xlu1 %v807_v9, %s756_s22 }
  0x1c   : > { %306 = vrot.lane.b32.xlu0 %v813_v11, %s756_s22  ;;  %270 = vrot.lane.b32.xlu1 %v813_v11, %s755_s21 }
  0x20   : > { %272 = vrot.lane.b32.xlu0 %v807_v9, %s755_s21  ;;  %279 = vrot.lane.b32.xlu1 %v237_v13, %s757_s23 }
  0x24   : > { %277 = vrot.lane.b32.xlu0 %v236_v12, %s757_s23  ;;  %288 = vrot.lane.b32.xlu1 %v803_v7, %s758_s24 }
  0x28   : > { %286 = vrot.lane.b32.xlu1 %v247_v14, %s758_s24  ;;  %290 = vrot.lane.b32.xlu0 %v248_v15, %s758_s24 }
  0x2c   : > { %299 = vrot.lane.b32.xlu1 %v247_v14, %s759_s25  ;;  %297 = vrot.lane.b32.xlu0 %v236_v12, %s759_s25 }
  0x30   : > { %240 = vrot.lane.b32.xlu1 %v237_v13, %s760_s26  ;;  %295 = vrot.lane.b32.xlu0 %v258_v16, %s759_s25  ;;  %s721_s25 = smul.u32 48, %s932_s16 }
  0x32   : > { %s907_s28 = scalar_lea.vmem %s930_s4, %s721_s25 }
  0x34   : > { %238 = vrot.lane.b32.xlu1 %v236_v12, %s760_s26  ;;  %242 = vrot.lane.b32.xlu0 %v803_v7, %s760_s26 }
  0x38   : > { %253 = vrot.lane.b32.xlu1 %v248_v15, %s762_s29  ;;  %251 = vrot.lane.b32.xlu0 %v803_v7, %s762_s29 }
  0x3c   : > { %261 = vrot.lane.b32.xlu1 %v236_v12, %s763_s30  ;;  %249 = vrot.lane.b32.xlu0 %v247_v14, %s762_s29 }
  0x40   : > { %259 = vrot.lane.b32.xlu1 %v258_v16, %s763_s30  ;;  %263 = vrot.lane.b32.xlu0 %v247_v14, %s763_s30 }
  0x44   : > { %499 = vperm.xlu1 %741, %v204_v19   ;;  %494 = vperm.xlu0 %740, %v203_v20  }
  0x48   : > { %504 = vperm.xlu1 %741, %v205_v21   ;;  %509 = vperm.xlu0 %740, %v206_v22  }
  0x4c   : > { %526 = vperm.xlu1 %741, %v207_v23   ;;  %531 = vperm.xlu0 %740, %v208_v24  }
  0x50   : > { %536 = vperm.xlu1 %741, %v209_v25   ;;  %541 = vperm.xlu0 %740, %v210_v26  }
  0x86   : > { %v269_v27 = vpop.permute.xlu1 %268  ;;  %v305_v28 = vpop.permute.xlu0 %304 }
  0x8a   : > { %v282_v29 = vpop.permute.xlu0 %281  ;;  %v309_v30 = vpop.permute.xlu1 %308 }
  0x8b   : > { %719 = vmatprep.subr.msk.bf16.mxu1 %vm313_vm1, %v309_v30  ;;  %v388_v31 = vsel %vm313_vm1, %v309_v30, 0 }
  0x8c   : > { %710 = vmatpush3.bf16.msra.mxu1 %v388_v31 }
  0x8e   : > { %v307_v32 = vpop.permute.xlu0 %306  ;;  %v271_v33 = vpop.permute.xlu1 %270 }
  0x8f   : > { %v312_v34 = vsel %vm310_vm2, %v307_v32, %v309_v30  ;;  %v311_v35 = vsel %vm310_vm2, %v305_v28, %v307_v32  ;;  %v275_v57 = vsel %vm274_vm5, %v269_v27, %v271_v33 }
  0x90   : > { %681 = vmatprep.subr.msk.bf16.mxu0 %vm313_vm1, %v312_v34  ;;  %v382_v36 = vsel %vm313_vm1, %v311_v35, 0 }
  0x91   : > { %401 = vmatpush1.bf16.msra.mxu0 %v382_v36 }
  0x92   : > { %v273_v37 = vpop.permute.xlu0 %272  ;;  %v280_v38 = vpop.permute.xlu1 %279 }
  0x93   : > { %v276_v43 = vsel %vm274_vm5, %v271_v33, %v273_v37  ;;  %v285_v44 = vsel %vm283_vm3, %v280_v38, %v282_v29  ;;  %v348_v46 = vsel %vm313_vm1, %v273_v37, %v282_v29 }
  0x94   : > { %v345_v47 = vsel %vm313_vm1, %v276_v43, %v285_v44 }
  0x96   : > { %v278_v39 = vpop.permute.xlu0 %277  ;;  %v289_v40 = vpop.permute.xlu1 %288 }
  0x97   : > { %v284_v51 = vsel %vm283_vm3, %v278_v39, %v280_v38 }
  0x98   : > { %v342_v58 = vsel %vm313_vm1, %v275_v57, %v284_v51 }
  0x9a   : > { %v287_v41 = vpop.permute.xlu1 %286  ;;  %v291_v42 = vpop.permute.xlu0 %290 }
  0x9b   : > { %v294_v45 = vsel %vm292_vm4, %v289_v40, %v291_v42  ;;  %v354_v48 = vsel %vm323_vm6, %v348_v46, %v291_v42  ;;  %v293_v55 = vsel %vm292_vm4, %v287_v41, %v289_v40 }
  0x9c   : > { %v352_v54 = vsel %vm323_vm6, %v345_v47, %v294_v45  ;;  %v350_v62 = vsel %vm323_vm6, %v342_v58, %v293_v55 }
  0x9e   : > { %v300_v49 = vpop.permute.xlu1 %299  ;;  %v298_v50 = vpop.permute.xlu0 %297 }
  0x9f   : > { %v303_v52 = vsel %vm301_vm7, %v298_v50, %v300_v49  ;;  %v362_v53 = vsel %vm330_vm8, %v354_v48, %v300_v49 }
  0xa0   : > { %711 = vmatprep.subr.bf16.mxu1 %v362_v53  ;;  %v359_v56 = vsel %vm330_vm8, %v352_v54, %v303_v52 }
  0xa1   : > { %402 = vmatprep.subr.bf16.mxu0 %v359_v56  ;;  %712 = vmatpush3.bf16.msra.mxu1 %v362_v53 }
  0xa2   : > { %v241_v59 = vpop.permute.xlu1 %240  ;;  %v296_v60 = vpop.permute.xlu0 %295 }
  0xa3   : > { %v302_v61 = vsel %vm301_vm7, %v296_v60, %v298_v50 }
  0xa4   : > { %v356_v63 = vsel %vm330_vm8, %v350_v62, %v302_v61 }
  0xa5   : > { %403 = vmatpush1.bf16.msra.mxu0 %v356_v63 }
  0xa6   : > { %v239_v0 = vpop.permute.xlu1 %238  ;;  %v243_v1 = vpop.permute.xlu0 %242 }
  0xa7   : > { %v246_v4 = vsel %vm244_vm9, %v241_v59, %v243_v1  ;;  %v245_v8 = vsel %vm244_vm9, %v239_v0, %v241_v59  ;;  %v322_v14 = vsel %vm313_vm1, %v807_v9, %v243_v1 }
  0xa8   : > { %v319_v13 = vsel %vm313_vm1, %v813_v11, %v246_v4  ;;  %v316_v15 = vsel %vm313_vm1, %v803_v7, %v245_v8  ;;  %v745_v7 = vld [vmem:[%s927_s1 + $0x8] sm:$0xff]  }
  0xaa   : > { %v254_v2 = vpop.permute.xlu1 %253  ;;  %v252_v3 = vpop.permute.xlu0 %251 }
  0xab   : > { %v257_v10 = vsel %vm255_vm10, %v252_v3, %v254_v2  ;;  %v329_v16 = vsel %vm323_vm6, %v322_v14, %v254_v2 }
  0xac   : > { %v327_v21 = vsel %vm323_vm6, %v319_v13, %v257_v10 }
  0xae   : > { %v262_v5 = vpop.permute.xlu1 %261  ;;  %v250_v6 = vpop.permute.xlu0 %249 }
  0xaf   : > { %v256_v12 = vsel %vm255_vm10, %v250_v6, %v252_v3 }
  0xb0   : > { %v325_v25 = vsel %vm323_vm6, %v316_v15, %v256_v12 }
  0xb2   : > { %v260_v19 = vpop.permute.xlu1 %259  ;;  %v264_v20 = vpop.permute.xlu0 %263 }
  0xb3   : > { %v266_v22 = vsel %vm265_vm11, %v260_v19, %v262_v5  ;;  %v267_v23 = vsel %vm265_vm11, %v262_v5, %v264_v20  ;;  %v338_v24 = vsel %vm330_vm8, %v329_v16, %v264_v20 }
  0xb4   : > { %713 = vmatprep.subr.bf16.mxu1 %v338_v24  ;;  %v335_v11 = vsel %vm330_vm8, %v327_v21, %v267_v23  ;;  %v332_v9 = vsel %vm330_vm8, %v325_v25, %v266_v22 }
  0xb5   : > { %404 = vmatprep.subr.bf16.mxu0 %v335_v11  ;;  %714 = vmatpush3.bf16.msra.mxu1 %v338_v24 }
  0xb6   : > { %405 = vmatpush1.bf16.msra.mxu0 %v332_v9 }
  0xb8   : > { %716 = vmatmul.mubr.msk.bf16.vlgmr.msra.gmra.mxu1 %vm374_vm0, %v745_v7 }
  0xb9   : > { %682 = vmatmul.mubr.msk.bf16.vlgmr.msra.gmra.mxu0 %vm374_vm0, %v827_v17 }
  0xba   : > { %432 = vmatprep.mubr.bf16.mxu0 %v761_v18 }
  0xbf   : > { %v500_v26 = vpop.permute.xlu1 %499  ;;  %v495_v27 = vpop.permute.xlu0 %494 }
  0xc1   : > { %683 = vmatmul.mubr.msk.bf16.gmra.mxu0 %vm374_vm0, %v745_v7 }
  0xc3   : > { %v505_v28 = vpop.permute.xlu1 %504  ;;  %v900_v29 = vpop.permute.xlu0 %509 }
  0xc7   : > { %v527_v30 = vpop.permute.xlu1 %526  ;;  %v532_v31 = vpop.permute.xlu0 %531 }
  0xcb   : > { %v537_v33 = vpop.permute.xlu1 %536  ;;  %v542_v42 = vpop.permute.xlu0 %541 }
 0x178   : > { %v717_v32 = vpop.f32.mrf.mxu1 }
 0x179   : > { %v520_v34 = vmul.f32 %v717_v32, %v505_v28  ;;  %v424_v35 = vpop.f32.mrf.mxu0 }
 0x17a   : > { %v512_v36 = vmul.f32 %v495_v27, %v424_v35  ;;  %v477_v37 = vpop.f32.mrf.mxu1 }
 0x17b   : > { %v514_v38 = vmul.f32 %v495_v27, %v477_v37  ;;  %v426_v17 = vpop.f32.mrf.mxu0  ;;  %v552_v39 = vadd.f32 %v537_v33, %v520_v34 }
 0x17c   : > { %v544_v18 = vadd.f32 %v527_v30, %v512_v36  ;;  %v513_v40 = vmul.f32 %v495_v27, %v426_v17  ;;  %v718_v41 = vpop.f32.mrf.mxu1 }
 0x17d   : > { %v546_v43 = vadd.f32 %v527_v30, %v514_v38  ;;  %v523_v44 = vmul.f32 %v718_v41, %v900_v29  ;;  %v564_v45 = vmax.f32 %v552_v39, 0.0  ;;  %v428_v46 = vpop.f32.mrf.mxu0 }
 0x17e   : > { %v545_v47 = vadd.f32 %v527_v30, %v513_v40  ;;  %v515_v48 = vmul.f32 %v500_v26, %v428_v46  ;;  %v480_v49 = vpop.f32.mrf.mxu1  ;;  %v556_v55 = vmax.f32 %v544_v18, 0.0 }
 0x17f   : > { %v558_v50 = vmax.f32 %v546_v43, 0.0  ;;  %v701_v51 = vpack.c.bf16 %v564_v45, %v564_v45  ;;  %v555_v52 = vadd.f32 %v542_v42, %v523_v44  ;;  %v517_v53 = vmul.f32 %v500_v26, %v480_v49  ;;  %v430_v54 = vpop.f32.mrf.mxu0 }
 0x180   : > { %v557_v56 = vmax.f32 %v545_v47, 0.0  ;;  %v547_v57 = vadd.f32 %v532_v31, %v515_v48  ;;  %v516_v58 = vmul.f32 %v500_v26, %v430_v54 }
 0x181   : > { %v697_v59 = vpack.c.bf16 %v558_v50, %v558_v50  ;;  %614 = vst.msk [vmem:[%s907_s28 + $0x20] sm:$0xf] %vm609_vm12, %v701_v51  ;;  %v567_v60 = vmax.f32 %v555_v52, 0.0  ;;  %v549_v61 = vadd.f32 %v532_v31, %v517_v53  ;;  %v434_v62 = vpop.f32.mrf.mxu0 }
 0x182   : > { %v696_v63 = vpack.c.bf16 %v557_v56, %v556_v55  ;;  %v548_v0 = vadd.f32 %v532_v31, %v516_v58  ;;  %v518_v1 = vmul.f32 %v505_v28, %v434_v62  ;;  %v559_v5 = vmax.f32 %v547_v57, 0.0 }
 0x183   : > { %610 = vst.msk [vmem:[%s907_s28 + $0x8] sm:$0xf] %vm609_vm12, %v697_v59  ;;  %v703_v2 = vpack.c.bf16 %v567_v60, %v567_v60  ;;  %v561_v3 = vmax.f32 %v549_v61, 0.0  ;;  %v436_v4 = vpop.f32.mrf.mxu0 }
 0x184   : > { %608 = vst [vmem:[%s907_s28] sm:$0xff] %v696_v63  ;;  %v560_v6 = vmax.f32 %v548_v0, 0.0  ;;  %v550_v8 = vadd.f32 %v537_v33, %v518_v1  ;;  %v519_v10 = vmul.f32 %v505_v28, %v436_v4 }
 0x185   : > { %616 = vst.msk [vmem:[%s907_s28 + $0x2c] sm:$0xf] %vm609_vm12, %v703_v2  ;;  %v699_v12 = vpack.c.bf16 %v561_v3, %v561_v3  ;;  %v438_v13 = vpop.f32.mrf.mxu0 }
 0x186   : > { %v698_v14 = vpack.c.bf16 %v560_v6, %v559_v5  ;;  %v551_v15 = vadd.f32 %v537_v33, %v519_v10  ;;  %v521_v16 = vmul.f32 %v900_v29, %v438_v13  ;;  %v562_v20 = vmax.f32 %v550_v8, 0.0 }
 0x187   : > { %612 = vst.msk [vmem:[%s907_s28 + $0x14] sm:$0xf] %vm609_vm12, %v699_v12  ;;  %v440_v19 = vpop.f32.mrf.mxu0 }
 0x188   : > { %611 = vst [vmem:[%s907_s28 + $0xc] sm:$0xff] %v698_v14  ;;  %v563_v21 = vmax.f32 %v551_v15, 0.0  ;;  %v553_v22 = vadd.f32 %v542_v42, %v521_v16  ;;  %v522_v23 = vmul.f32 %v900_v29, %v440_v19 }
 0x18a   : > { %v700_v24 = vpack.c.bf16 %v563_v21, %v562_v20  ;;  %v554_v25 = vadd.f32 %v542_v42, %v522_v23  ;;  %v565_v11 = vmax.f32 %v553_v22, 0.0 }
 0x18c   : > { %613 = vst [vmem:[%s907_s28 + $0x18] sm:$0xff] %v700_v24  ;;  %v566_v9 = vmax.f32 %v554_v25, 0.0 }
 0x18e   : > { %v702_v7 = vpack.c.bf16 %v566_v9, %v565_v11 }
 0x190   : > { %615 = vst [vmem:[%s907_s28 + $0x24] sm:$0xff] %v702_v7 }
 0x191 PF: > { %s14_s15 = sadd.s32 1, %s752_s15  }
 0x192   : > { %p11_p4 = scmp.ge.s32.totalorder %s14_s15, 4  }
 0x194   :  { %13 = sbr.rel (!%p11_p4) target bundleno = 1 (0x1), region = 66 }

</bundles_post_ra>
